<compile_context>
chip_gen: v7x
topology: tpu7x:2x2x1
jax: 0.10.0
libtpu: 0.0.40
codegen_flags: <defaults>
</compile_context>

<pallas_src>
import math

import jax
import jax.numpy as jnp
from jax.experimental import pallas as pl
from jax.experimental.pallas import tpu as pltpu


def _round_up(x, m):
    return (x + m - 1) // m * m


def _pad_axis(a, axis, new_size):
    pad = new_size - a.shape[axis]
    if pad == 0:
        return a
    widths = [(0, 0)] * a.ndim
    widths[axis] = (0, pad)
    return jnp.pad(a, widths)


def _mlp_head_kernel(x_ref, w1_ref, b1_ref, w2_ref, b2_ref, o_ref, h_ref):
    # Grid = (row_tiles, vocab_tiles).  Compute h for this row tile only once,
    # at the first vocab tile, and cache it in VMEM scratch.
    @pl.when(pl.program_id(1) == 0)
    def _():
        h = jnp.dot(x_ref[...], w1_ref[...],
                    preferred_element_type=jnp.float32)
        h = jnp.maximum(h + b1_ref[...].astype(jnp.float32), 0.0)   # bias+ReLU once per row tile
        h_ref[...] = h.astype(h_ref.dtype)

    # Second GEMM: (TM, H) @ (H, TN) on the MXU, f32 accumulation.
    out = jnp.dot(h_ref[...], w2_ref[...],
                  preferred_element_type=jnp.float32)
    o_ref[...] = (out + b2_ref[...].astype(jnp.float32)).astype(o_ref.dtype)


def text_self_supervised_head(x, w1, b1, w2, b2, *, tm=256, tn=512,
                              compute_dtype=None):
    """x: [..., H]; w1: [H, H]; b1: [H]; w2: [H, V]; b2: [V] -> logits [..., V]."""
    *lead, hidden = x.shape
    voc = w2.shape[1]
    out_dtype = x.dtype

    m = math.prod(lead) if lead else 1
    x2d = x.reshape(m, hidden)

    # Optional low-precision compute path (f32 accumulation preserved in-kernel).
    cdt = jnp.dtype(compute_dtype) if compute_dtype is not None else jnp.dtype(x2d.dtype)
    x2d = x2d.astype(cdt)
    w1c = w1.astype(cdt)
    w2c = w2.astype(cdt)
    b1_2d = b1.reshape(1, hidden)
    b2_2d = b2.reshape(1, voc)

    # Tile sizes: TM multiple of 8 (sublane), TN multiple of 128 (lane-dense
    # output stores), clamped to the padded problem size.
    tm_eff = min(tm, _round_up(m, 8))
    tn_eff = min(tn, _round_up(voc, 128))
    m_pad = _round_up(m, tm_eff)
    v_pad = _round_up(voc, tn_eff)

    x2d = _pad_axis(x2d, 0, m_pad)
    w2c = _pad_axis(w2c, 1, v_pad)
    b2_2d = _pad_axis(b2_2d, 1, v_pad)

    grid = (m_pad // tm_eff, v_pad // tn_eff)

    # TODO(synk): add a K-tiled (contraction) grid axis for H >= 2048 so the
    # resident W1 block stays bounded (H*TK instead of H*H).

    item = cdt.itemsize
    out_item = jnp.dtype(out_dtype).itemsize
    est_vmem = (2 * tm_eff * hidden * item        # x tiles (double-buffered)
                + 2 * hidden * hidden * item      # W1 (resident)
                + 2 * hidden * item               # b1
                + 2 * hidden * tn_eff * item      # W2 tiles
                + 2 * tn_eff * item               # b2 tiles
                + 2 * tm_eff * tn_eff * out_item  # out tiles
                + tm_eff * hidden * item)         # h scratch
    # Raise above small scoped defaults, but cap so it also fits v7x (64 MiB).
    vmem_limit = int(min(max(est_vmem + (8 << 20), 32 << 20), 56 << 20))

    flops = 2 * m_pad * hidden * hidden + 2 * m_pad * hidden * v_pad
    bytes_accessed = (m_pad * hidden * item
                      + hidden * hidden * item
                      + grid[0] * hidden * v_pad * item   # W2 streamed per row tile
                      + m_pad * v_pad * out_item)
    cost = pl.CostEstimate(flops=flops, transcendentals=0,
                           bytes_accessed=int(bytes_accessed))

    out2d = pl.pallas_call(
        _mlp_head_kernel,
        out_shape=jax.ShapeDtypeStruct((m_pad, v_pad), out_dtype),
        grid=grid,
        in_specs=[
            pl.BlockSpec((tm_eff, hidden), lambda i, j: (i, 0)),   # x row tile
            pl.BlockSpec((hidden, hidden), lambda i, j: (0, 0)),   # W1 (resident)
            pl.BlockSpec((1, hidden), lambda i, j: (0, 0)),        # b1
            pl.BlockSpec((hidden, tn_eff), lambda i, j: (0, j)),   # W2 vocab tile
            pl.BlockSpec((1, tn_eff), lambda i, j: (0, j)),        # b2 vocab tile
        ],
        out_specs=pl.BlockSpec((tm_eff, tn_eff), lambda i, j: (i, j)),
        scratch_shapes=[pltpu.VMEM((tm_eff, hidden), cdt)],        # cached h
        compiler_params=pltpu.CompilerParams(
            dimension_semantics=("parallel", "arbitrary"),
            vmem_limit_bytes=vmem_limit),
        cost_estimate=cost,
    )(x2d, w1c, b1_2d, w2c, b2_2d)

    out2d = out2d[:m, :voc]
    return out2d.reshape(*lead, voc)


def init_params(key, input_size, output_size, dtype=jnp.float32):
    """Deterministic synthetic parameters with PyTorch nn.Linear-like scaling."""
    k1, k2, k3, k4 = jax.random.split(key, 4)
    lim1 = 1.0 / (input_size ** 0.5)
    w1 = jax.random.uniform(k1, (input_size, input_size), dtype, -lim1, lim1)
    b1 = jax.random.uniform(k2, (input_size,), dtype, -lim1, lim1)
    lim2 = 1.0 / (input_size ** 0.5)
    w2 = jax.random.uniform(k3, (input_size, output_size), dtype, -lim2, lim2)
    b2 = jax.random.uniform(k4, (output_size,), dtype, -lim2, lim2)
    return w1, b1, w2, b2


if __name__ == "__main__":
    batch, seq, hidden, voc = 2, 8, 32, 64
    key = jax.random.PRNGKey(0)
    kx, kp = jax.random.split(key)

    text_input = jax.random.normal(kx, (batch, seq, hidden), jnp.float32)
    w1, b1, w2, b2 = init_params(kp, hidden, voc)

    # f32 path (exact match to reference)
    out = text_self_supervised_head(text_input, w1, b1, w2, b2)
    out = jax.block_until_ready(out)

    ref = jnp.maximum(text_input @ w1 + b1, 0.0) @ w2 + b2
    assert out.shape == (batch, seq, voc)
    assert jnp.allclose(out, ref, atol=1e-5, rtol=1e-5)

    # bf16 compute path smoke test (f32 accumulation preserved in-kernel)
    out_bf16 = text_self_supervised_head(text_input, w1, b1, w2, b2,
                                         compute_dtype=jnp.bfloat16)
    out_bf16 = jax.block_until_ready(out_bf16)
    assert out_bf16.shape == (batch, seq, voc)
    assert bool(jnp.all(jnp.isfinite(out_bf16)))
    assert jnp.allclose(out_bf16, ref, atol=0.1, rtol=0.1)

    print("KERNEL_OK")
</pallas_src>

<mosaic_0001>
module attributes {stable_mosaic.version = 11 : i64} {
  func.func @_mlp_head_kernel(%arg0: i32, %arg1: i32, %arg2: memref<16x32xf32, #tpu.memory_space<vmem>>, %arg3: memref<32x32xf32, #tpu.memory_space<vmem>>, %arg4: memref<1x32xf32, #tpu.memory_space<vmem>>, %arg5: memref<32x128xf32, #tpu.memory_space<vmem>>, %arg6: memref<1x128xf32, #tpu.memory_space<vmem>>, %arg7: memref<16x128xf32, #tpu.memory_space<vmem>>, %arg8: memref<16x32xf32, #tpu.memory_space<vmem>>) attributes {dimension_semantics = [#tpu.dimension_semantics<parallel>, #tpu.dimension_semantics<arbitrary>], iteration_bounds = array<i64: 1, 1>, scalar_prefetch = 0 : i64, scratch_operands = 1 : i64, tpu.core_type = #tpu.core_type<tc>, window_params = [{transform_indices = @transform_0, window_bounds = array<i64: 16, 32>}, {pipeline_mode = #tpu.pipeline_mode<synchronous>, transform_indices = @transform_1, window_bounds = array<i64: 32, 32>}, {pipeline_mode = #tpu.pipeline_mode<synchronous>, transform_indices = @transform_2, window_bounds = array<i64: 1, 32>}, {transform_indices = @transform_3, window_bounds = array<i64: 32, 128>}, {transform_indices = @transform_4, window_bounds = array<i64: 1, 128>}, {transform_indices = @transform_5, window_bounds = array<i64: 16, 128>}]} {
    %c0_i32 = arith.constant 0 : i32
    %0 = arith.cmpi eq, %arg1, %c0_i32 : i32
    %1 = arith.extui %0 : i1 to i32
    %c0_i32_0 = arith.constant 0 : i32
    %2 = arith.cmpi ne, %1, %c0_i32_0 : i32
    scf.if %2 {
      %c0_8 = arith.constant 0 : index
      %c0_9 = arith.constant 0 : index
      %10 = vector.load %arg2[%c0_8, %c0_9] : memref<16x32xf32, #tpu.memory_space<vmem>>, vector<16x32xf32>
      %c0_10 = arith.constant 0 : index
      %c0_11 = arith.constant 0 : index
      %11 = vector.load %arg3[%c0_10, %c0_11] : memref<32x32xf32, #tpu.memory_space<vmem>>, vector<32x32xf32>
      %cst_12 = arith.constant dense<0.000000e+00> : vector<16x32xf32>
      %12 = tpu.matmul %10, %11, %cst_12 {dimension_numbers = #tpu.dot_dimension_numbers<[1], [0], [0], [1], [0, 0, 1, 1], [], []>} : vector<16x32xf32>, vector<32x32xf32>, vector<16x32xf32> -> vector<16x32xf32>
      %c0_13 = arith.constant 0 : index
      %c0_14 = arith.constant 0 : index
      %13 = vector.load %arg4[%c0_13, %c0_14] : memref<1x32xf32, #tpu.memory_space<vmem>>, vector<1x32xf32>
      %14 = vector.broadcast %13 : vector<1x32xf32> to vector<16x32xf32>
      %15 = arith.addf %12, %14 : vector<16x32xf32>
      %cst_15 = arith.constant 0.000000e+00 : f32
      %16 = vector.broadcast %cst_15 : f32 to vector<16x32xf32>
      %17 = arith.maximumf %15, %16 : vector<16x32xf32>
      %c0_16 = arith.constant 0 : index
      %c0_17 = arith.constant 0 : index
      %18 = vector.load %arg8[%c0_16, %c0_17] : memref<16x32xf32, #tpu.memory_space<vmem>>, vector<16x32xf32>
      tpu.vector_store %arg8[%c0_16, %c0_17], %17 {strides = array<i32>} : memref<16x32xf32, #tpu.memory_space<vmem>>, vector<16x32xf32>,
    } else {
    }
    %c0 = arith.constant 0 : index
    %c0_1 = arith.constant 0 : index
    %3 = vector.load %arg8[%c0, %c0_1] : memref<16x32xf32, #tpu.memory_space<vmem>>, vector<16x32xf32>
    %c0_2 = arith.constant 0 : index
    %c0_3 = arith.constant 0 : index
    %4 = vector.load %arg5[%c0_2, %c0_3] : memref<32x128xf32, #tpu.memory_space<vmem>>, vector<32x128xf32>
    %cst = arith.constant dense<0.000000e+00> : vector<16x128xf32>
    %5 = tpu.matmul %3, %4, %cst {dimension_numbers = #tpu.dot_dimension_numbers<[1], [0], [0], [1], [0, 0, 1, 1], [], []>} : vector<16x32xf32>, vector<32x128xf32>, vector<16x128xf32> -> vector<16x128xf32>
    %c0_4 = arith.constant 0 : index
    %c0_5 = arith.constant 0 : index
    %6 = vector.load %arg6[%c0_4, %c0_5] : memref<1x128xf32, #tpu.memory_space<vmem>>, vector<1x128xf32>
    %7 = vector.broadcast %6 : vector<1x128xf32> to vector<16x128xf32>
    %8 = arith.addf %5, %7 : vector<16x128xf32>
    %c0_6 = arith.constant 0 : index
    %c0_7 = arith.constant 0 : index
    %9 = vector.load %arg7[%c0_6, %c0_7] : memref<16x128xf32, #tpu.memory_space<vmem>>, vector<16x128xf32>
    tpu.vector_store %arg7[%c0_6, %c0_7], %8 {strides = array<i32>} : memref<16x128xf32, #tpu.memory_space<vmem>>, vector<16x128xf32>,
    return
  }
  func.func @transform_0(%arg0: i32, %arg1: i32) -> (i32, i32) {
    %c0_i32 = arith.constant 0 : i32
    %c0_i32_0 = arith.constant 0 : i32
    return %arg0, %c0_i32 : i32, i32
  }
  func.func @transform_1(%arg0: i32, %arg1: i32) -> (i32, i32) {
    %c0_i32 = arith.constant 0 : i32
    %c0_i32_0 = arith.constant 0 : i32
    %c0_i32_1 = arith.constant 0 : i32
    return %c0_i32, %c0_i32_0 : i32, i32
  }
  func.func @transform_2(%arg0: i32, %arg1: i32) -> (i32, i32) {
    %c0_i32 = arith.constant 0 : i32
    %c0_i32_0 = arith.constant 0 : i32
    %c0_i32_1 = arith.constant 0 : i32
    return %c0_i32, %c0_i32_0 : i32, i32
  }
  func.func @transform_3(%arg0: i32, %arg1: i32) -> (i32, i32) {
    %c0_i32 = arith.constant 0 : i32
    %c0_i32_0 = arith.constant 0 : i32
    return %c0_i32, %arg1 : i32, i32
  }
  func.func @transform_4(%arg0: i32, %arg1: i32) -> (i32, i32) {
    %c0_i32 = arith.constant 0 : i32
    %c0_i32_0 = arith.constant 0 : i32
    return %c0_i32, %arg1 : i32, i32
  }
  func.func @transform_5(%arg0: i32, %arg1: i32) -> (i32, i32) {
    %c0_i32 = arith.constant 0 : i32
    return %arg0, %arg1 : i32, i32
  }
}

</mosaic_0001>

<bundles_post_ra>
// kernel: tpu_custom_call.1
= control target key start
LH: loop header
LB: loop body
LE: loop exit
PB: predicated region body
PF: predicated region fallthrough
CT: control target
= control target key end

     0   :  { %10 = vsyncpa [#allocation4], 0  ;;  %s551_s0 = inlined_call_operand.hbm [shape: f32[16,32], index: 0, kind: input, shape index: {}]   ;;  %s552_s1 = inlined_call_operand.hbm [shape: f32[32,32], index: 1, kind: input, shape index: {}]   ;;  %s553_s2 = inlined_call_operand.vmem [shape: f32[1,32], index: 2, kind: input, shape index: {}]   ;;  %s554_s3 = inlined_call_operand.hbm [shape: f32[32,128], index: 3, kind: input, shape index: {}]   ;;  %s555_s4 = inlined_call_operand.vmem [shape: f32[1,128], index: 4, kind: input, shape index: {}]   ;;  %s556_s5 = inlined_call_operand.hbm [shape: f32[16,128], index: 5, kind: output, shape index: {}]  }
   0x1   :  { %11 = vsyncpa [#allocation7], 0 }
   0x2   :  { %12 = vsyncpa [#allocation5], 0  ;;  %s436_s18 = smov [#allocation6]   ;;  %s437_s20 = smov [#allocation3]  }
   0x3   :  { %s30_s19 = sshll.u32 %s436_s18, 4  ;;  %s18_s21 = sshll.u32 %s437_s20, 4  ;;  %s31_s19 = int_to_ptr.vmem [resolvable:$true] %s30_s19  ;;  %s472_s21 = int_to_ptr.vmem [resolvable:$true] %s18_s21 }
   0x4   :  { %s342_s24 = scalar_lea.hbm %s552_s1, 512 }
   0x5   :  { %p343_p0 = scmp.ne.s32.totalorder %s552_s1, %s342_s24  ;;  %p346_p1 = scmp.lt.u32.totalorder %s342_s24, %s552_s1 }
   0x7   :  { %p348_p2 = pnand %p346_p1, %p343_p0 }
   0x9   :  { %351 = shalt.err (!%p348_p2)
}
   0xa   :  { %s352_s29 = scalar_lea.vmem %s31_s19, 512  ;;  %p357_p4 = scmp.lt.s32.totalorder %s31_s19, %s31_s19 }
   0xb   :  { %p353_p3 = scmp.ne.s32.totalorder %s31_s19, %s352_s29  ;;  %p358_p5 = scmp.lt.s32.totalorder %s352_s29, %s352_s29 }
   0xd   :  { %p359_p6 = por %p358_p5, %p357_p4 }
   0xf   :  { %p360_p7 = pnand %p359_p6, %p353_p3 }
  0x11   :  { %363 = shalt.err (!%p360_p7)
}
  0x12   :  { %s438_s30 = smov 128   ;;  %s439_s6 = smov 8  }
  0x13   :  { %36 = dma.hbm_to_vmem [thread:$0]  %s552_s1, 512, %s31_s19, [#allocation7], %s438_s30, %s438_s30, %s439_s6  }
  0x14   :  { %s364_s11 = scalar_lea.hbm %s551_s0, 256 }
  0x15   :  { %p365_p8 = scmp.ne.s32.totalorder %s551_s0, %s364_s11  ;;  %p368_p9 = scmp.lt.u32.totalorder %s364_s11, %s551_s0 }
  0x17   :  { %p370_p10 = pnand %p368_p9, %p365_p8 }
  0x19   :  { %373 = shalt.err (!%p370_p10)
}
  0x1a   :  { %s374_s16 = scalar_lea.vmem %s472_s21, 256  ;;  %p379_p12 = scmp.lt.s32.totalorder %s472_s21, %s472_s21 }
  0x1b   :  { %p375_p11 = scmp.ne.s32.totalorder %s472_s21, %s374_s16  ;;  %p380_p13 = scmp.lt.s32.totalorder %s374_s16, %s374_s16 }
  0x1d   :  { %p381_p0 = por %p380_p13, %p379_p12 }
  0x1f   :  { %p382_p1 = pnand %p381_p0, %p375_p11 }
  0x21   :  { %385 = shalt.err (!%p382_p1)
}
  0x22   :  { %24 = dma.hbm_to_vmem [thread:$0]  %s551_s0, 256, %s472_s21, [#allocation4], %s438_s30, %s438_s30, %s439_s6  }
  0x23   :  { %s440_s18 = smov [#allocation8]   ;;  %s386_s23 = scalar_lea.hbm %s554_s3, 512 }
  0x24   :  { %s44_s19 = sshll.u32 %s440_s18, 4  ;;  %p387_p2 = scmp.ne.s32.totalorder %s554_s3, %s386_s23  ;;  %s45_s19 = int_to_ptr.vmem [resolvable:$true] %s44_s19 }
  0x25   :  { %p390_p3 = scmp.lt.u32.totalorder %s386_s23, %s554_s3 }
  0x27   :  { %p392_p4 = pnand %p390_p3, %p387_p2 }
  0x29   :  { %395 = shalt.err (!%p392_p4)
}
  0x2a   :  { %s396_s28 = scalar_lea.vmem %s45_s19, 512  ;;  %p401_p6 = scmp.lt.s32.totalorder %s45_s19, %s45_s19 }
  0x2b   :  { %p397_p5 = scmp.ne.s32.totalorder %s45_s19, %s396_s28  ;;  %p402_p7 = scmp.lt.s32.totalorder %s396_s28, %s396_s28 }
  0x2d   :  { %p403_p8 = por %p402_p7, %p401_p6 }
  0x2f   :  { %p404_p9 = pnand %p403_p8, %p397_p5 }
  0x31   :  { %407 = shalt.err (!%p404_p9)
}
  0x32   :  { %50 = dma.hbm_to_vmem [thread:$0]  %s554_s3, 512, %s45_s19, [#allocation7], %s438_s30, %s438_s30, %s439_s6  }
  0x33   :  { %430 = dma.done.wait [#allocation4], 256  }
  0x34   :  { %431 = vsyncadd [#allocation4], 4294967040 }
  0x35   :  { %432 = dma.done.wait [#allocation7], 1024  }
  0x36   :  { %433 = vsyncadd [#allocation7], 4294966272  ;;  %vm79_vm0 = vcmask 261120   ;;  %v68_v0 = vld [vmem:[#allocation6] sm:$0xff]  ;;  %v69_v1 = vld [vmem:[#allocation6 + $0x8] sm:$0xff] }
  0x37   :  { %v70_v2 = vld [vmem:[#allocation6 + $0x10] sm:$0xff]  ;;  %v320_v3 = vpack.c.bf16 %v69_v1, %v68_v0  ;;  %v71_v4 = vld [vmem:[#allocation6 + $0x18] sm:$0xff]  ;;  %v167_v8 = vld [vmem:[#allocation8] sm:$0xff] }
  0x38   :  { %v66_v5 = vld [vmem:[#allocation3] sm:$0xff]  ;;  %v324_v6 = vpack.c.bf16 %v71_v4, %v70_v2  ;;  %v67_v7 = vld [vmem:[#allocation3 + $0x8] sm:$0xff]  ;;  %v168_v9 = vld [vmem:[#allocation8 + $0x8] sm:$0xff] }
  0x39   :  { %306 = vmatprep.mubr.msk.f32.mxu0 %vm79_vm0, %v66_v5  ;;  %321 = vmatprep.subr.bf16.mxu0 %v320_v3  ;;  %v328_v10 = vpack.c.bf16 %v168_v9, %v167_v8  ;;  %v169_v11 = vld [vmem:[#allocation8 + $0x10] sm:$0xff]  ;;  %v170_v12 = vld [vmem:[#allocation8 + $0x18] sm:$0xff]  ;;  %v280_v14 = vld [vmem:[%s553_s2] ss:$0 sm:$0xff]  ;;  %s441_s2 = smov [#allocation9]  }
  0x3a   :  { %323 = vmatpush3.bf16.msra.mxu0 %v320_v3  ;;  %v332_v13 = vpack.c.bf16 %v170_v12, %v169_v11  ;;  %v283_v23 = vld [vmem:[%s555_s4] ss:$0 sm:$0xff]  ;;  %s267_s9 = sshll.u32 %s441_s2, 4  ;;  %s268_s9 = int_to_ptr.vmem [resolvable:$true] %s267_s9 }
  0x3b   :  { %325 = vmatprep.subr.bf16.mxu0 %v324_v6  ;;  %329 = vmatprep.subr.bf16.mxu1 %v328_v10  ;;  %s408_s10 = scalar_lea.vmem %s268_s9, 256  ;;  %p413_p11 = scmp.lt.s32.totalorder %s268_s9, %s268_s9 }
  0x3c   :  { %331 = vmatpush3.bf16.msra.mxu1 %v328_v10  ;;  %p409_p10 = scmp.ne.s32.totalorder %s268_s9, %s408_s10  ;;  %p414_p12 = scmp.lt.s32.totalorder %s408_s10, %s408_s10 }
  0x3d   :  { %333 = vmatprep.subr.bf16.mxu1 %v332_v13 }
  0x3e   :  { %327 = vmatpush3.bf16.msra.mxu0 %v324_v6  ;;  %p415_p13 = por %p414_p12, %p413_p11 }
  0x40   :  { %335 = vmatpush3.bf16.msra.mxu1 %v332_v13  ;;  %p416_p0 = pnand %p415_p13, %p409_p10 }
  0x41   :  { %307 = vmatmul.mubr.msk.f32.vlgmr.msra.gmra.mrb[0].mxu0 %vm79_vm0, %v67_v7 }
 0x114   :  { %v308_v15 = vpop.f32.mrb[0].mxu0 }
 0x115   :  { %v158_v16 = vadd.f32 %v308_v15, %v280_v14  ;;  %v152_v17 = vpop.f32.mrb[1].mxu0 }
 0x116   :  { %v153_v18 = vadd.f32 %v280_v14, %v152_v17 }
 0x117   :  { %v162_v19 = vmax.f32 %v158_v16, 0.0 }
 0x118   :  { %v161_v20 = vmax.f32 %v153_v18, 0.0 }
 0x119   :  { %164 = vst.msk [vmem:[#allocation2 + $0x8] sm:$0xff] %vm79_vm0, %v162_v19 }
 0x11a   :  { %163 = vst.msk [vmem:[#allocation2] sm:$0xff] %vm79_vm0, %v161_v20 }
 0x120   :  { %v166_v22 = vld [vmem:[#allocation2 + $0x8] sm:$0xff] }
 0x121   :  { %v165_v21 = vld [vmem:[#allocation2] sm:$0xff] }
 0x122   :  { %317 = vmatprep.mubr.msk.f32.mxu1 %vm79_vm0, %v165_v21 }
 0x123   :  { %318 = vmatmul.mubr.msk.f32.vlgmr.msra.gmra.mrb[0].mxu1 %vm79_vm0, %v166_v22 }
 0x1f6   :  { %v319_v24 = vpop.f32.mrb[0].mxu1 }
 0x1f7   :  { %v257_v25 = vadd.f32 %v319_v24, %v283_v23  ;;  %v251_v26 = vpop.f32.mrb[1].mxu1 }
 0x1f8   :  { %v252_v27 = vadd.f32 %v283_v23, %v251_v26 }
 0x1f9   :  { %261 = vst [vmem:[#allocation9 + $0x8] sm:$0xff] %v257_v25 }
 0x1fa   :  { %260 = vst [vmem:[#allocation9] sm:$0xff] %v252_v27 }
 0x1fb   :  { %419 = shalt.err (!%p416_p0)
}
 0x1fc   :  { %s420_s4 = scalar_lea.hbm %s556_s5, 256 }
 0x1fd   :  { %p421_p1 = scmp.ne.s32.totalorder %s556_s5, %s420_s4  ;;  %p424_p2 = scmp.lt.u32.totalorder %s420_s4, %s556_s5 }
 0x1ff   :  { %p426_p3 = pnand %p424_p2, %p421_p1 }
 0x201   :  { %429 = shalt.err (!%p426_p3)
}
 0x202   :  { %273 = dma.vmem_to_hbm [thread:$0]  %s268_s9, 256, %s556_s5, [#allocation5], %s438_s30, %s438_s30, %s439_s6  }
 0x203   :  { %434 = dma.done.wait [#allocation5], 256  }
 0x204   :  { %435 = vsyncadd [#allocation5], 4294967040 }
 0x205   :  { %277 = vsyncpa [#allocation4], 1 }
 0x206   :  { %278 = vsyncpa [#allocation7], 1 }
 0x207   :  { %279 = vsyncpa [#allocation5], 1 }

</bundles_post_ra>
